<compile_context>
chip_gen: v5e
topology: v5e:2x2
jax: 0.10.0
libtpu: 0.0.40
codegen_flags: <defaults>
</compile_context>

<pallas_src>
import functools

import jax
import jax.numpy as jnp
from jax.experimental import pallas as pl
from jax.experimental.pallas import tpu as pltpu


def _hnn_mlp_kernel(xT_ref, w1T_ref, b1T_ref, w2T_ref, b2T_ref, w3T_ref, yT_ref):
    """One batch tile: 3-layer MLP in batch-in-lane layout.

    xT_ref : (D, TILE_B)   w1T_ref: (H, D)   b1T_ref: (H, 1)
    w2T_ref: (H, H)        b2T_ref: (H, 1)   w3T_ref: (D, H)
    yT_ref : (D, TILE_B)
    """
    xT = xT_ref[...]
    h1 = jnp.tanh(
        jnp.dot(w1T_ref[...], xT, preferred_element_type=jnp.float32)
        + b1T_ref[...])
    h2 = jnp.tanh(
        jnp.dot(w2T_ref[...], h1, preferred_element_type=jnp.float32)
        + b2T_ref[...])
    yT_ref[...] = jnp.dot(w3T_ref[...], h2,
                          preferred_element_type=jnp.float32)


@functools.partial(jax.jit, static_argnames=("tile_b", "baseline"))
def hnn_forward(x, params, *, tile_b=1024, baseline=False):
    """Pallas-backed HNN.forward. Returns (F1, F2), or y if baseline=True."""
    w1, b1, w2, b2, w3 = params
    B, D = x.shape
    assert D % 2 == 0
    H = w1.shape[1]
    half = D // 2

    # --- layout plumbing (cheap XLA views/transposes on tiny arrays) ---------
    w1T = jnp.transpose(w1)                      # (H, D)
    w2T = jnp.transpose(w2)                      # (H, H)
    w3T = jnp.transpose(w3)                      # (D, H)
    b1T = jnp.reshape(b1, (H, 1))                # (H, 1)
    b2T = jnp.reshape(b2, (H, 1))                # (H, 1)

    # Tile the batch along the lane axis: multiple of 128 for unmasked stores,
    # but never larger than the (128-rounded) batch itself.
    tile_b = max(128, (int(tile_b) // 128) * 128)
    tile_b = min(tile_b, 128 * pl.cdiv(B, 128))
    grid_b = pl.cdiv(B, tile_b)
    b_pad = grid_b * tile_b

    xT = jnp.pad(jnp.transpose(x), ((0, 0), (0, b_pad - B)))   # (D, B_pad)

    resident = lambda i: (0, 0)   # weights/biases: same block every grid step
    yT = pl.pallas_call(
        _hnn_mlp_kernel,
        out_shape=jax.ShapeDtypeStruct((D, b_pad), jnp.float32),
        grid=(grid_b,),
        in_specs=[
            pl.BlockSpec((D, tile_b), lambda i: (0, i)),   # xT tile (pipelined)
            pl.BlockSpec((H, D), resident),                # W1ᵀ
            pl.BlockSpec((H, 1), resident),                # b1ᵀ
            pl.BlockSpec((H, H), resident),                # W2ᵀ
            pl.BlockSpec((H, 1), resident),                # b2ᵀ
            pl.BlockSpec((D, H), resident),                # W3ᵀ
        ],
        out_specs=pl.BlockSpec((D, tile_b), lambda i: (0, i)),
        compiler_params=pltpu.CompilerParams(
            dimension_semantics=("parallel",),    # shard batch tiles across TCs (v7x)
            vmem_limit_bytes=32 * 1024 * 1024,    # explicit: safe on v7x 64 MiB VMEM
        ),
    )(xT, w1T, b1T, w2T, b2T, w3T)

    y = jnp.transpose(yT[:, :B])                 # (B, D) — free slices/views
    if baseline:
        return y
    return y[:, :half], y[:, half:]


def permutation_tensor(n):
    """HNN.permutation_tensor (assume_canonical_coords=True); built in __init__,
    unused by forward. Pure-JAX glue."""
    m = jnp.eye(n, dtype=jnp.float32)
    return jnp.concatenate([m[n // 2:], -m[:n // 2]], axis=0)


def _reference_forward(x, params):
    """Pure-JAX reference of the same forward pass for validation."""
    w1, b1, w2, b2, w3 = params
    h1 = jnp.tanh(x @ w1 + b1)
    h2 = jnp.tanh(h1 @ w2 + b2)
    y = h2 @ w3
    half = x.shape[1] // 2
    return y[:, :half], y[:, half:]


if __name__ == "__main__":
    # Phase-space input (q, p): even input_dim=4, hidden=32, batch=8.
    input_dim = 4
    hidden = 32
    batch = 8

    key = jax.random.PRNGKey(0)
    k_x, k_w1, k_b1, k_w2, k_b2, k_w3 = jax.random.split(key, 6)

    x = jax.random.normal(k_x, (batch, input_dim), dtype=jnp.float32)

    # Weights stored as [in, out] (transpose of nn.Linear); linear3 has no bias.
    w1 = 0.1 * jax.random.normal(k_w1, (input_dim, hidden), dtype=jnp.float32)
    b1 = 0.1 * jax.random.normal(k_b1, (1, hidden), dtype=jnp.float32)
    w2 = 0.1 * jax.random.normal(k_w2, (hidden, hidden), dtype=jnp.float32)
    b2 = 0.1 * jax.random.normal(k_b2, (1, hidden), dtype=jnp.float32)
    w3 = 0.1 * jax.random.normal(k_w3, (hidden, input_dim), dtype=jnp.float32)
    params = (w1, b1, w2, b2, w3)

    # Built in __init__ (unused by forward); included for fidelity.
    M = permutation_tensor(input_dim)

    f1, f2 = hnn_forward(x, params)
    jax.block_until_ready((f1, f2))

    # Validate against pure-JAX reference.
    r1, r2 = _reference_forward(x, params)
    assert f1.shape == (batch, input_dim // 2)
    assert f2.shape == (batch, input_dim // 2)
    assert jnp.allclose(f1, r1, atol=1e-5, rtol=1e-5)
    assert jnp.allclose(f2, r2, atol=1e-5, rtol=1e-5)

    # Also exercise a batch that is not a multiple of the tile (padding path).
    xb = jax.random.normal(jax.random.PRNGKey(1), (300, input_dim), jnp.float32)
    g1, g2 = hnn_forward(xb, params, tile_b=256)
    jax.block_until_ready((g1, g2))
    s1, s2 = _reference_forward(xb, params)
    assert jnp.allclose(g1, s1, atol=1e-5, rtol=1e-5)
    assert jnp.allclose(g2, s2, atol=1e-5, rtol=1e-5)

    # TODO(synk): time_derivative() needs autograd of F1/F2 w.r.t. x
    # (torch.autograd.grad); do it in the JAX wrapper via jax.grad/jax.vjp over
    # hnn_forward (or fuse the JVP into this kernel to amortize launch cost);
    # out of scope for the forward pass.
    print("KERNEL_OK")
</pallas_src>

<mosaic_0001>
module attributes {stable_mosaic.version = 11 : i64} {
  func.func @_hnn_mlp_kernel(%arg0: i32, %arg1: memref<4x128xf32, #tpu.memory_space<vmem>>, %arg2: memref<32x4xf32, #tpu.memory_space<vmem>>, %arg3: memref<32x1xf32, #tpu.memory_space<vmem>>, %arg4: memref<32x32xf32, #tpu.memory_space<vmem>>, %arg5: memref<32x1xf32, #tpu.memory_space<vmem>>, %arg6: memref<4x32xf32, #tpu.memory_space<vmem>>, %arg7: memref<4x128xf32, #tpu.memory_space<vmem>>) attributes {dimension_semantics = [#tpu.dimension_semantics<parallel>], iteration_bounds = array<i64: 1>, scalar_prefetch = 0 : i64, scratch_operands = 0 : i64, tpu.core_type = #tpu.core_type<tc>, window_params = [{transform_indices = @transform_0, window_bounds = array<i64: 4, 128>}, {pipeline_mode = #tpu.pipeline_mode<synchronous>, transform_indices = @transform_1, window_bounds = array<i64: 32, 4>}, {pipeline_mode = #tpu.pipeline_mode<synchronous>, transform_indices = @transform_2, window_bounds = array<i64: 32, 1>}, {pipeline_mode = #tpu.pipeline_mode<synchronous>, transform_indices = @transform_3, window_bounds = array<i64: 32, 32>}, {pipeline_mode = #tpu.pipeline_mode<synchronous>, transform_indices = @transform_4, window_bounds = array<i64: 32, 1>}, {pipeline_mode = #tpu.pipeline_mode<synchronous>, transform_indices = @transform_5, window_bounds = array<i64: 4, 32>}, {transform_indices = @transform_6, window_bounds = array<i64: 4, 128>}]} {
    %c0 = arith.constant 0 : index
    %c0_0 = arith.constant 0 : index
    %0 = vector.load %arg1[%c0, %c0_0] : memref<4x128xf32, #tpu.memory_space<vmem>>, vector<4x128xf32>
    %c0_1 = arith.constant 0 : index
    %c0_2 = arith.constant 0 : index
    %1 = vector.load %arg2[%c0_1, %c0_2] : memref<32x4xf32, #tpu.memory_space<vmem>>, vector<32x4xf32>
    %cst = arith.constant dense<0.000000e+00> : vector<32x128xf32>
    %2 = tpu.matmul %1, %0, %cst {dimension_numbers = #tpu.dot_dimension_numbers<[1], [0], [0], [1], [0, 0, 1, 1], [], []>} : vector<32x4xf32>, vector<4x128xf32>, vector<32x128xf32> -> vector<32x128xf32>
    %c0_3 = arith.constant 0 : index
    %c0_4 = arith.constant 0 : index
    %3 = vector.load %arg3[%c0_3, %c0_4] : memref<32x1xf32, #tpu.memory_space<vmem>>, vector<32x1xf32>
    %4 = vector.broadcast %3 : vector<32x1xf32> to vector<32x128xf32>
    %5 = arith.addf %2, %4 : vector<32x128xf32>
    %6 = math.tanh %5 : vector<32x128xf32>
    %c0_5 = arith.constant 0 : index
    %c0_6 = arith.constant 0 : index
    %7 = vector.load %arg4[%c0_5, %c0_6] : memref<32x32xf32, #tpu.memory_space<vmem>>, vector<32x32xf32>
    %cst_7 = arith.constant dense<0.000000e+00> : vector<32x128xf32>
    %8 = tpu.matmul %7, %6, %cst_7 {dimension_numbers = #tpu.dot_dimension_numbers<[1], [0], [0], [1], [0, 0, 1, 1], [], []>} : vector<32x32xf32>, vector<32x128xf32>, vector<32x128xf32> -> vector<32x128xf32>
    %c0_8 = arith.constant 0 : index
    %c0_9 = arith.constant 0 : index
    %9 = vector.load %arg5[%c0_8, %c0_9] : memref<32x1xf32, #tpu.memory_space<vmem>>, vector<32x1xf32>
    %10 = vector.broadcast %9 : vector<32x1xf32> to vector<32x128xf32>
    %11 = arith.addf %8, %10 : vector<32x128xf32>
    %12 = math.tanh %11 : vector<32x128xf32>
    %c0_10 = arith.constant 0 : index
    %c0_11 = arith.constant 0 : index
    %13 = vector.load %arg6[%c0_10, %c0_11] : memref<4x32xf32, #tpu.memory_space<vmem>>, vector<4x32xf32>
    %cst_12 = arith.constant dense<0.000000e+00> : vector<4x128xf32>
    %14 = tpu.matmul %13, %12, %cst_12 {dimension_numbers = #tpu.dot_dimension_numbers<[1], [0], [0], [1], [0, 0, 1, 1], [], []>} : vector<4x32xf32>, vector<32x128xf32>, vector<4x128xf32> -> vector<4x128xf32>
    %c0_13 = arith.constant 0 : index
    %c0_14 = arith.constant 0 : index
    %15 = vector.load %arg7[%c0_13, %c0_14] : memref<4x128xf32, #tpu.memory_space<vmem>>, vector<4x128xf32>
    tpu.vector_store %arg7[%c0_13, %c0_14], %14 {strides = array<i32>} : memref<4x128xf32, #tpu.memory_space<vmem>>, vector<4x128xf32>,
    return
  }
  func.func @transform_0(%arg0: i32) -> (i32, i32) {
    %c0_i32 = arith.constant 0 : i32
    %c0_i32_0 = arith.constant 0 : i32
    return %c0_i32, %arg0 : i32, i32
  }
  func.func @transform_1(%arg0: i32) -> (i32, i32) {
    %c0_i32 = arith.constant 0 : i32
    %c0_i32_0 = arith.constant 0 : i32
    %c0_i32_1 = arith.constant 0 : i32
    return %c0_i32, %c0_i32_0 : i32, i32
  }
  func.func @transform_2(%arg0: i32) -> (i32, i32) {
    %c0_i32 = arith.constant 0 : i32
    %c0_i32_0 = arith.constant 0 : i32
    %c0_i32_1 = arith.constant 0 : i32
    return %c0_i32, %c0_i32_0 : i32, i32
  }
  func.func @transform_3(%arg0: i32) -> (i32, i32) {
    %c0_i32 = arith.constant 0 : i32
    %c0_i32_0 = arith.constant 0 : i32
    %c0_i32_1 = arith.constant 0 : i32
    return %c0_i32, %c0_i32_0 : i32, i32
  }
  func.func @transform_4(%arg0: i32) -> (i32, i32) {
    %c0_i32 = arith.constant 0 : i32
    %c0_i32_0 = arith.constant 0 : i32
    %c0_i32_1 = arith.constant 0 : i32
    return %c0_i32, %c0_i32_0 : i32, i32
  }
  func.func @transform_5(%arg0: i32) -> (i32, i32) {
    %c0_i32 = arith.constant 0 : i32
    %c0_i32_0 = arith.constant 0 : i32
    %c0_i32_1 = arith.constant 0 : i32
    return %c0_i32, %c0_i32_0 : i32, i32
  }
  func.func @transform_6(%arg0: i32) -> (i32, i32) {
    %c0_i32 = arith.constant 0 : i32
    %c0_i32_0 = arith.constant 0 : i32
    return %c0_i32, %arg0 : i32, i32
  }
}

</mosaic_0001>

<bundles_post_ra>
// kernel: hnn_forward.1
= control target key start
LH: loop header
LB: loop body
LE: loop exit
PB: predicated region body
PF: predicated region fallthrough
CT: control target
= control target key end

     0   :  { %vm65_vm0 = vcmask 1043456   ;;  %vm52_vm1 = vcmask 31744   ;;  %v240_v2 = vmov 0   ;;  %vm130_vm2 = vcmask 261120   ;;  %s342_s0 = inlined_call_operand.vmem [shape: f32[4,128], index: 0, kind: input, shape index: {}]   ;;  %s343_s1 = inlined_call_operand.vmem [shape: f32[32,4], index: 1, kind: input, shape index: {}]   ;;  %s344_s2 = inlined_call_operand.vmem [shape: f32[32,1], index: 2, kind: input, shape index: {}]   ;;  %s345_s4 = inlined_call_operand.vmem [shape: f32[32,1], index: 4, kind: input, shape index: {}]   ;;  %s346_s3 = inlined_call_operand.vmem [shape: f32[32,32], index: 3, kind: input, shape index: {}]   ;;  %s347_s5 = inlined_call_operand.vmem [shape: f32[4,32], index: 5, kind: input, shape index: {}]   ;;  %s348_s6 = inlined_call_operand.vmem [shape: f32[4,128], index: 6, kind: output, shape index: {}]  }
   0x1   :  { %v23_v0 = vld [vmem:[%s342_s0] sm:$0xf]  ;;  %222 = vset.pattern.permute.xlu1 %v240_v2  ;;  %221 = vset.pattern.permute.xlu0 %v240_v2  ;;  %v27_v3 = vld [vmem:[%s343_s1 + $0x18] sm:$0xff]  ;;  %v29_v5 = vld [vmem:[%s344_s2 + $0x8] sm:$0xff] }
   0x2   :  { %v24_v1 = vld [vmem:[%s343_s1] sm:$0xff]  ;;  %205 = vmatpush.msk.msra.mxu0 %vm65_vm0, %v23_v0  ;;  %215 = vmatpush.msk.msra.mxu2 %vm65_vm0, %v23_v0  ;;  %v31_v4 = vld [vmem:[%s344_s2 + $0x18] sm:$0xff]  ;;  %v25_v6 = vld [vmem:[%s343_s1 + $0x8] sm:$0xff] }
   0x3   :  { %206 = vmatmul.msk.f32.vlgmr.msra.gmra.mxu0 %vm52_vm1, %v24_v1  ;;  %209 = vmatmul.msk.f32.vlgmr.msra.gmra.mxu2 %vm52_vm1, %v27_v3  ;;  %v30_v7 = vld [vmem:[%s344_s2 + $0x10] sm:$0xff]  ;;  %v28_v8 = vld [vmem:[%s344_s2] sm:$0xff]  ;;  %v107_v10 = vld [vmem:[%s345_s4 + $0x8] sm:$0xff] }
   0x4   :  { %49 = vperm.xlu0 %221, %v31_v4   ;;  %39 = vperm.xlu1 %222, %v29_v5   ;;  %v26_v9 = vld [vmem:[%s343_s1 + $0x10] sm:$0xff]  ;;  %v106_v11 = vld [vmem:[%s345_s4] sm:$0xff]  ;;  %v109_v17 = vld [vmem:[%s345_s4 + $0x18] sm:$0xff] }
   0x5   :  { %223 = vset.pattern.permute.xlu2 %v240_v2  ;;  %v108_v19 = vld [vmem:[%s345_s4 + $0x10] sm:$0xff]  ;;  %v102_v29 = vld [vmem:[%s346_s3] sm:$0xff]  ;;  %v103_v32 = vld [vmem:[%s346_s3 + $0x8] sm:$0xff] }
   0x6   :  { %127 = vperm.xlu2 %223, %v109_v17   ;;  %v104_v30 = vld [vmem:[%s346_s3 + $0x10] sm:$0xff]  ;;  %v105_v33 = vld [vmem:[%s346_s3 + $0x18] sm:$0xff]  ;;  %v176_v49 = vld [vmem:[%s347_s5] sm:$0xf] }
   0xb   :  { %207 = vmatmul.msk.f32.gmra.mxu0 %vm52_vm1, %v25_v6 }
   0xc   :  { %44 = vperm.xlu0 %221, %v30_v7   ;;  %34 = vperm.xlu1 %222, %v28_v8  }
   0xe   :  { %122 = vperm.xlu2 %223, %v108_v19  }
  0x13   :  { %208 = vmatmul.msk.f32.gmra.mxu0 %vm52_vm1, %v26_v9 }
  0x14   :  { %117 = vperm.xlu0 %221, %v107_v10   ;;  %112 = vperm.xlu1 %222, %v106_v11  }
  0x60   :  { %v128_v34 = vpop.permute.xlu2 %127 }
  0x68   :  { %v123_v37 = vpop.permute.xlu2 %122 }
  0x76   :  { %v50_v13 = vpop.permute.xlu0 %49  ;;  %v40_v14 = vpop.permute.xlu1 %39 }
  0x7e   :  { %v45_v21 = vpop.permute.xlu0 %44  ;;  %v35_v22 = vpop.permute.xlu1 %34 }
  0x80   :  { %v86_v12 = vpop.f32.mrf.mxu0 }
  0x81   :  { %v87_v26 = vadd.f32 %v86_v12, %v35_v22 }
  0x86   :  { %v95_v15 = vpop.f32.mrf.mxu2  ;;  %v118_v42 = vpop.permute.xlu0 %117 }
  0x87   :  { %v96_v16 = vadd.f32 %v95_v15, %v50_v13  ;;  %v113_v44 = vpop.permute.xlu1 %112 }
  0x88   :  { %v89_v18 = vpop.f32.mrf.mxu0 }
  0x89   :  { %224 = vtanh.f32 %v96_v16  ;;  %v90_v24 = vadd.f32 %v89_v18, %v40_v14 }
  0x8f   :  { %v225_v20 = vpop.eup %224 }
  0x90   :  { %v92_v23 = vpop.f32.mrf.mxu0  ;;  %155 = vmatpush.msra.mxu1 %v225_v20  ;;  %216 = vmatpush.msra.mxu3 %v225_v20 }
  0x91   :  { %v93_v25 = vadd.f32 %v92_v23, %v45_v21 }
  0x93   :  { %226 = vtanh.f32 %v93_v25 }
  0x94   :  { %228 = vtanh.f32 %v90_v24 }
  0x95   :  { %230 = vtanh.f32 %v87_v26 }
  0x99   :  { %v227_v27 = vpop.eup %226 }
  0x9a   :  { %156 = vmatpush.msra.mxu1 %v227_v27  ;;  %217 = vmatpush.msra.mxu3 %v227_v27  ;;  %v229_v28 = vpop.eup %228 }
  0x9b   :  { %v231_v31 = vpop.eup %230 }
  0x9c   :  { %157 = vmatpush.msra.mxu1 %v229_v28  ;;  %218 = vmatpush.msra.mxu3 %v229_v28 }
  0x9e   :  { %158 = vmatpush.msra.mxu1 %v231_v31  ;;  %219 = vmatpush.msra.mxu3 %v231_v31 }
  0x9f   :  { %210 = vmatmul.msk.f32.vlgmr.msra.gmra.mxu1 %vm130_vm2, %v102_v29  ;;  %212 = vmatmul.msk.f32.vlgmr.msra.gmra.mxu3 %vm130_vm2, %v104_v30 }
  0xa7   :  { %211 = vmatmul.msk.f32.gmra.mxu1 %vm130_vm2, %v103_v32  ;;  %213 = vmatmul.msk.f32.gmra.mxu3 %vm130_vm2, %v105_v33 }
 0x11c   :  { %v160_v35 = vpop.f32.mrf.mxu1 }
 0x11d   :  { %v161_v45 = vadd.f32 %v160_v35, %v113_v44 }
 0x122   :  { %v166_v36 = vpop.f32.mrf.mxu3 }
 0x123   :  { %v167_v40 = vadd.f32 %v166_v36, %v123_v37 }
 0x124   :  { %v163_v38 = vpop.f32.mrf.mxu1 }
 0x125   :  { %v164_v43 = vadd.f32 %v163_v38, %v118_v42 }
 0x12a   :  { %v169_v39 = vpop.f32.mrf.mxu3 }
 0x12b   :  { %v170_v41 = vadd.f32 %v169_v39, %v128_v34 }
 0x12d   :  { %232 = vtanh.f32 %v170_v41 }
 0x12e   :  { %234 = vtanh.f32 %v167_v40 }
 0x12f   :  { %236 = vtanh.f32 %v164_v43 }
 0x130   :  { %238 = vtanh.f32 %v161_v45 }
 0x133   :  { %v233_v46 = vpop.eup %232 }
 0x134   :  { %192 = vmatpush.msrb.mxu2 %v233_v46  ;;  %v235_v47 = vpop.eup %234 }
 0x135   :  { %v237_v48 = vpop.eup %236 }
 0x136   :  { %193 = vmatpush.msrb.mxu2 %v235_v47  ;;  %v239_v50 = vpop.eup %238 }
 0x138   :  { %194 = vmatpush.msrb.mxu2 %v237_v48 }
 0x13a   :  { %195 = vmatpush.msrb.mxu2 %v239_v50 }
 0x13b   :  { %214 = vmatmul.msk.f32.vlgmr.msrb.gmra.mxu2 %vm130_vm2, %v176_v49 }
 0x1be   :  { %v197_v51 = vpop.f32.mrf.mxu2 }
 0x1bf   :  { %200 = vst [vmem:[%s348_s6] sm:$0xf] %v197_v51 }

</bundles_post_ra>
